<compile_context>
chip_gen: v5e
topology: v5e:2x2
jax: 0.10.0
libtpu: 0.0.40
codegen_flags: <defaults>
</compile_context>

<pallas_src>
import math

import jax
import jax.numpy as jnp
from jax.experimental import pallas as pl
from jax.experimental.pallas import tpu as pltpu

_DEFAULT_CHUNK_BYTES = 8 << 20   # ~8 MiB/chunk: past the HBM copy-roofline knee
_N_INFLIGHT = 4                  # DMA chunks kept in flight
_MAX_CHUNKS = 1024               # bound on the static DMA-issue unroll


def _pick_width(total: int):
    """Lane-dense width (large multiple of 128) dividing total, or None."""
    for w in (2048, 1024, 512, 256, 128):
        if total % w == 0:
            return w
    return None  # no clean lane-dense view -> caller falls back to metadata reshape


def _pick_chunk_rows(R: int, row_bytes: int, chunk_bytes: int) -> int:
    """Rows per DMA chunk: ~chunk_bytes, multiple of 32, bounded chunk count."""
    rows = max(1, chunk_bytes // row_bytes)
    if rows >= 32:
        rows = (rows // 32) * 32   # keep packed sublane rows (bf16/int8) whole
    rows = min(rows, R)
    # Keep the static Python issue loop bounded for very large tensors.
    while -(-R // rows) > _MAX_CHUNKS:
        rows = min(R, rows * 2)
    return rows


def _make_hbm_copy_kernel(R: int, chunk_rows: int, n_inflight: int):
    """Kernel that streams (R, W) HBM -> HBM with n_inflight chunked DMAs."""
    n_chunks = -(-R // chunk_rows)

    def kernel(x_ref, o_ref, sems):
        copies = []
        for c in range(n_chunks):           # static unroll (shapes are static)
            start = c * chunk_rows
            size = min(chunk_rows, R - start)
            slot = c % n_inflight
            cp = pltpu.make_async_copy(
                x_ref.at[pl.ds(start, size)],
                o_ref.at[pl.ds(start, size)],
                sems.at[slot],
            )
            if c >= n_inflight:
                # Free this semaphore slot before reusing it.
                copies[c - n_inflight].wait()
            cp.start()
            copies.append(cp)
        # Drain the tail of in-flight copies.
        for cp in copies[max(0, n_chunks - n_inflight):]:
            cp.wait()

    return kernel


def pallas_reshape(features: jax.Array, target_size, *, force_copy: bool = False,
                   chunk_bytes: int = _DEFAULT_CHUNK_BYTES) -> jax.Array:
    target_size = tuple(int(t) for t in target_size)
    total = features.size
    tgt_elems = math.prod(target_size) if target_size else 1
    assert tgt_elems > 0 and total % tgt_elems == 0, (
        "input size not divisible by target size")
    batch = total // tgt_elems
    final_shape = (batch, *target_size)

    # Fast path (default): contiguous reshape is metadata-only -> zero copy.
    if not force_copy or total == 0:
        return features.reshape(final_shape)

    itemsize = jnp.dtype(features.dtype).itemsize
    W = _pick_width(total)
    if W is None:
        # No lane-dense 2D view exists (prime-ish totals): a Pallas copy would
        # be masked, sub-128-lane and pathological on v5e -> metadata reshape.
        return features.reshape(final_shape)

    R = total // W
    x2d = features.reshape(R, W)                 # metadata-only view for the copy
    chunk_rows = _pick_chunk_rows(R, W * itemsize, chunk_bytes)

    out2d = pl.pallas_call(
        _make_hbm_copy_kernel(R, chunk_rows, _N_INFLIGHT),
        out_shape=jax.ShapeDtypeStruct((R, W), features.dtype),
        in_specs=[pl.BlockSpec(memory_space=pl.ANY)],     # raw HBM ref, no auto-DMA
        out_specs=pl.BlockSpec(memory_space=pl.ANY),      # raw HBM ref, DMA'd manually
        scratch_shapes=[pltpu.SemaphoreType.DMA((_N_INFLIGHT,))],
    )(x2d)

    return out2d.reshape(final_shape)


if __name__ == "__main__":
    key = jax.random.PRNGKey(0)
    x = jax.random.normal(key, (2, 4, 16, 16), dtype=jnp.float32)
    target_size = (4, 16, 16)
    ref = x.reshape((-1, *target_size))

    # 1) Default path: metadata-only reshape (the fastest, copy elided).
    out = jax.block_until_ready(pallas_reshape(x, target_size))
    assert out.shape == ref.shape and out.dtype == ref.dtype
    assert bool(jnp.array_equal(out, ref))

    # 2) Pallas HBM->HBM DMA copy path (single chunk).
    out_p = jax.block_until_ready(pallas_reshape(x, target_size, force_copy=True))
    assert out_p.shape == ref.shape and bool(jnp.array_equal(out_p, ref))

    # 3) Pallas copy with several in-flight chunks (exercise the DMA chain).
    x2 = jax.random.normal(jax.random.PRNGKey(0), (16, 4, 16, 16), dtype=jnp.float32)
    out2 = jax.block_until_ready(
        pallas_reshape(x2, (8, 128), force_copy=True, chunk_bytes=16 << 10))
    ref2 = x2.reshape((-1, 8, 128))
    assert out2.shape == ref2.shape and bool(jnp.array_equal(out2, ref2))

    # 4) Awkward element count (no multiple-of-128 width) -> metadata fallback.
    x3 = jax.random.normal(jax.random.PRNGKey(0), (3, 5, 7), dtype=jnp.float32)
    out3 = jax.block_until_ready(pallas_reshape(x3, (7,), force_copy=True))
    ref3 = x3.reshape((-1, 7))
    assert out3.shape == ref3.shape and bool(jnp.array_equal(out3, ref3))

    print("KERNEL_OK")
</pallas_src>

<mosaic_0001>
module attributes {stable_mosaic.version = 11 : i64} {
  func.func @kernel(%arg0: memref<1x2048xf32, #tpu.memory_space<any>>, %arg1: memref<1x2048xf32, #tpu.memory_space<any>>, %arg2: memref<4x!tpu.dma_semaphore, #tpu.memory_space<semaphore_mem>>) attributes {dimension_semantics = [], scalar_prefetch = 0 : i64, scratch_operands = 1 : i64, tpu.core_type = #tpu.core_type<tc>} {
    %c0_i32 = arith.constant 0 : i32
    %c0_i32_0 = arith.constant 0 : i32
    %c0_i32_1 = arith.constant 0 : i32
    %0 = tpu.memref_slice %arg0[%c0_i32_0, %c0_i32_1] : memref<1x2048xf32, #tpu.memory_space<any>> -> memref<1x2048xf32, #tpu.memory_space<any>>
    %c0_i32_2 = arith.constant 0 : i32
    %c0_i32_3 = arith.constant 0 : i32
    %1 = tpu.memref_slice %arg1[%c0_i32_2, %c0_i32_3] : memref<1x2048xf32, #tpu.memory_space<any>> -> memref<1x2048xf32, #tpu.memory_space<any>>
    %2 = tpu.memref_slice %arg2[%c0_i32] : memref<4x!tpu.dma_semaphore, #tpu.memory_space<semaphore_mem>> -> memref<1x!tpu.dma_semaphore, #tpu.memory_space<semaphore_mem>>
    %3 = tpu.memref_squeeze %2 : memref<1x!tpu.dma_semaphore, #tpu.memory_space<semaphore_mem>> -> memref<!tpu.dma_semaphore, #tpu.memory_space<semaphore_mem>>
    tpu.enqueue_dma source(%0 : memref<1x2048xf32, #tpu.memory_space<any>>) target(%1 : memref<1x2048xf32, #tpu.memory_space<any>>) target_semaphore(%3 : memref<!tpu.dma_semaphore, #tpu.memory_space<semaphore_mem>>)
    %c0_i32_4 = arith.constant 0 : i32
    %c0_i32_5 = arith.constant 0 : i32
    %c0_i32_6 = arith.constant 0 : i32
    %4 = tpu.memref_slice %arg0[%c0_i32_5, %c0_i32_6] : memref<1x2048xf32, #tpu.memory_space<any>> -> memref<1x2048xf32, #tpu.memory_space<any>>
    %c0_i32_7 = arith.constant 0 : i32
    %c0_i32_8 = arith.constant 0 : i32
    %5 = tpu.memref_slice %arg1[%c0_i32_7, %c0_i32_8] : memref<1x2048xf32, #tpu.memory_space<any>> -> memref<1x2048xf32, #tpu.memory_space<any>>
    %6 = tpu.memref_slice %arg2[%c0_i32_4] : memref<4x!tpu.dma_semaphore, #tpu.memory_space<semaphore_mem>> -> memref<1x!tpu.dma_semaphore, #tpu.memory_space<semaphore_mem>>
    %7 = tpu.memref_squeeze %6 : memref<1x!tpu.dma_semaphore, #tpu.memory_space<semaphore_mem>> -> memref<!tpu.dma_semaphore, #tpu.memory_space<semaphore_mem>>
    tpu.wait_dma2 semaphore(%7 : memref<!tpu.dma_semaphore, #tpu.memory_space<semaphore_mem>>) src(%4 : memref<1x2048xf32, #tpu.memory_space<any>>) dst(%5 : memref<1x2048xf32, #tpu.memory_space<any>>)
    return
  }
}

</mosaic_0001>

<bundles_post_ra>
// kernel: tpu_custom_call.1
= control target key start
LH: loop header
LB: loop body
LE: loop exit
PB: predicated region body
PF: predicated region fallthrough
CT: control target
= control target key end

     0   :  { %s56_s12 = smov [#allocation2]   ;;  %s57_s13 = smov [#allocation3]   ;;  %s75_s0 = inlined_call_operand.hbm [shape: f32[1,2048], index: 0, kind: input, shape index: {}]   ;;  %s76_s1 = inlined_call_operand.hbm [shape: f32[1,2048], index: 1, kind: output, shape index: {}]  }
   0x1   :  { %s10_s8 = sshll.u32 %s75_s0, 4  ;;  %s12_s11 = sshll.u32 %s76_s1, 4  ;;  %s11_s8 = int_to_ptr.hbm [resolvable:$true] %s10_s8  ;;  %s13_s11 = int_to_ptr.hbm [resolvable:$true] %s12_s11 }
   0x2   :  { %s58_s14 = smov 0  }
   0x3   :  { %16 = dma.general %s11_s8, 256, %s13_s11, %s56_s12, %s57_s13, [#allocation4], %s58_s14, 0  }
   0x4   :  { %54 = dma.done.wait [#allocation2], 256 }
   0x5   :  { %55 = vsyncadd [#allocation2], 4294967040 }
   0x6   :  { %20 = vsyncmov [#allocation2] }
   0x9   :  { %s21_s15 = vpop.sfrf %20 }
   0xa   :  { %p47_p0 = scmp.ne.s32.totalorder %s21_s15, 0 }
   0xc   :  { %25 = shalt.err (%p47_p0)  }
   0xd   :  { %27 = vsyncmov [#allocation2 + $0x1] }
  0x10   :  { %s28_s16 = vpop.sfrf %27 }
  0x11   :  { %p48_p1 = scmp.ne.s32.totalorder %s28_s16, 0 }
  0x13   :  { %32 = shalt.err (%p48_p1)  }
  0x14   :  { %34 = vsyncmov [#allocation2 + $0x2] }
  0x17   :  { %s35_s0 = vpop.sfrf %34 }
  0x18   :  { %p49_p2 = scmp.ne.s32.totalorder %s35_s0, 0 }
  0x1a   :  { %39 = shalt.err (%p49_p2)  }
  0x1b   :  { %41 = vsyncmov [#allocation2 + $0x3] }
  0x1e   :  { %s42_s1 = vpop.sfrf %41 }
  0x1f   :  { %p50_p3 = scmp.ne.s32.totalorder %s42_s1, 0 }
  0x21   :  { %46 = shalt.err (%p50_p3)  }

</bundles_post_ra>
